<compile_context>
chip_gen: v5e
topology: v5e:2x2
jax: 0.10.0
libtpu: 0.0.40
codegen_flags: <defaults>
</compile_context>

<pallas_src>
import math

import jax
import jax.numpy as jnp
from jax.experimental import pallas as pl
from jax.experimental.pallas import tpu as pltpu


def _round_up(n, m):
    return ((n + m - 1) // m) * m


# ----------------------------------------------------------------------------
# Kernel body: two MXU matmuls + f32 bias/tanh, per (row tile, super-group).
# ----------------------------------------------------------------------------
def _rfmn_kernel(x_ref, a_in_ref, b_ref, a_out_ref, o_ref):
    # x_ref    : (tb, band_p)   halo'd slab tile for this (row tile, super-group)
    # a_in_ref : (band_p, Hsg)  shared banded inner weight
    # b_ref    : (1, Hsg)       f32 tiled inner bias
    # a_out_ref: (Hsg, PG)      shared block-diagonal outer weight
    # o_ref    : (tb, PG)       lane-dense output tile (written exactly once)
    h = jnp.dot(x_ref[...], a_in_ref[...], preferred_element_type=jnp.float32)
    h = jnp.tanh(h + b_ref[...])                       # bias-add + tanh in f32
    y = jnp.dot(h.astype(a_out_ref.dtype), a_out_ref[...],
                preferred_element_type=jnp.float32)
    o_ref[...] = y.astype(o_ref.dtype)


# ----------------------------------------------------------------------------
# Parameter packing (pure function of the static params -> call ONCE).
# ----------------------------------------------------------------------------
def _choose_p(Ng, G, D_r, lane=256):
    """Smallest P dividing Ng with P*G and P*D_r lane/MXU aligned (keeps MXU
    tiles full while minimising the ~P/(2I+1) FLOP inflation of the banded
    packing).  Falls back to a single super-group (P = Ng) when no such P
    exists (e.g. tiny demo shapes), which is always correct."""
    for P in range(1, Ng + 1):
        if Ng % P == 0 and (P * G) % lane == 0 and (P * D_r) % lane == 0:
            return P
    return Ng
    # TODO(synk): for prime-ish Ng, allow P not dividing Ng by padding the
    # group axis instead of falling back to P = Ng.


def pack_local_rfmn_params(params, *, D, D_r, G, I,
                           compute_dtype=jnp.bfloat16, P=None):
    """Fold the shared per-group MLP + circular local-window gather into
    per-super-group banded / block-diagonal weights (built directly at small
    P-sized intermediates and cast once to the compute dtype)."""
    assert D % G == 0, "G must divide D"
    Ng = D // G
    L = (2 * I + 1) * G
    if P is None:
        P = _choose_p(Ng, G, D_r)
    assert Ng % P == 0, "P must divide Ng"
    S = Ng // P
    band = (P + 2 * I) * G
    band_p = band if S == 1 else _round_up(band, 128)   # lane-aligned slab chunk
    Hsg = P * D_r
    PG = P * G

    w_in = jnp.asarray(params["w_in"], jnp.float32)     # (D_r, L)  torch (out, in)
    b_in = jnp.asarray(params["b_in"], jnp.float32)     # (D_r,)
    w_out = jnp.asarray(params["w_out"], jnp.float32)   # (G, D_r)  torch (out, in)

    # A_in[p*G + k, p*D_r + r] = W_in[r, k]   (same band for every super-group;
    # rows >= band are zero so the slab's lane padding contributes nothing).
    j = jnp.arange(band_p)
    k = j[:, None] - jnp.arange(P)[None, :] * G                   # (band_p, P)
    valid = (k >= 0) & (k < L)
    gath = jnp.take(w_in.T, jnp.clip(k, 0, L - 1), axis=0)        # (band_p, P, D_r)
    a_in = jnp.where(valid[..., None], gath, 0.0).reshape(band_p, Hsg)

    # A_out[p*D_r + r, p*G + g] = W_out[g, r]   (block diagonal).
    a_out = (jnp.eye(P, dtype=jnp.float32)[:, None, :, None]
             * w_out.T[None, :, None, :]).reshape(Hsg, PG)

    b_big = jnp.tile(b_in, P).reshape(1, Hsg)                     # stays f32

    cfg = dict(D=D, D_r=D_r, G=G, I=I, Ng=Ng, P=P, S=S, band=band,
               band_p=band_p, Hsg=Hsg, PG=PG, compute_dtype=compute_dtype)
    packed = dict(a_in=a_in.astype(compute_dtype), b_big=b_big,
                  a_out=a_out.astype(compute_dtype))
    return packed, cfg


# ----------------------------------------------------------------------------
# pallas_call wrapper.
# ----------------------------------------------------------------------------
def _vmem_budget_bytes():
    try:
        cap = int(pltpu.get_tpu_info().vmem_capacity_bytes)
    except Exception:
        cap = 64 * 1024 * 1024            # conservative (v7x-sized) fallback
    return (cap * 3) // 4                 # ~48 MiB on v7x, ~96 MiB on v5e/v6e


def _pallas_apply(slab, a_in, b_big, a_out, *, cfg, out_dtype,
                  single_buffer_weights):
    Mpad = slab.shape[0]
    S, band_p, Hsg, PG, D = (cfg["S"], cfg["band_p"], cfg["Hsg"],
                             cfg["PG"], cfg["D"])
    cdtype = cfg["compute_dtype"]
    cbytes = jnp.dtype(cdtype).itemsize
    obytes = jnp.dtype(out_dtype).itemsize

    # --- generation-aware row-tile selection --------------------------------
    w_bufs = 1 if single_buffer_weights else 2
    weight_bytes = w_bufs * ((band_p * Hsg + Hsg * PG) * cbytes + Hsg * 4)
    per_row = (2 * band_p * cbytes        # slab tile (double-buffered)
               + 2 * PG * obytes          # output tile (double-buffered)
               + Hsg * 4                  # hidden activation, f32
               + Hsg * cbytes             # hidden recast for the 2nd MXU pass
               + PG * 4)                  # f32 result before the output cast
    budget = _vmem_budget_bytes()
    avail = budget - weight_bytes - (2 << 20)
    tb = max(8, min(2048, avail // per_row)) if avail > 8 * per_row else 8
    tb = max(8, (tb // 8) * 8)
    if tb >= 256:
        tb = (tb // 256) * 256            # full MXU passes on v6e/v7x
    if Mpad >= 16:                        # >= 2 row tiles: megacore + pipelining
        tb = min(tb, _round_up(-(-Mpad // 2), 8))
    tb = min(tb, Mpad)
    grid_rows = -(-Mpad // tb)            # ragged last row block is clipped by Pallas

    vmem_limit = int(max(16 << 20,
                         min(budget, weight_bytes + tb * per_row + (8 << 20))))

    # Grid-invariant weights: constant index_map, request single buffering.
    wkw = {"pipeline_mode": pl.Buffered(1)} if single_buffer_weights else {}

    flops = 2 * Mpad * S * (band_p * Hsg + Hsg * PG)
    transcendentals = Mpad * S * Hsg
    bytes_accessed = (Mpad * S * band_p * cbytes + Mpad * D * obytes
                      + (band_p * Hsg + Hsg * PG) * cbytes + Hsg * 4)

    return pl.pallas_call(
        _rfmn_kernel,
        out_shape=jax.ShapeDtypeStruct((Mpad, D), out_dtype),
        grid=(grid_rows, S),
        in_specs=[
            pl.BlockSpec((tb, band_p), lambda i, s: (i, s)),
            pl.BlockSpec((band_p, Hsg), lambda i, s: (0, 0), **wkw),
            pl.BlockSpec((1, Hsg), lambda i, s: (0, 0), **wkw),
            pl.BlockSpec((Hsg, PG), lambda i, s: (0, 0), **wkw),
        ],
        out_specs=pl.BlockSpec((tb, PG), lambda i, s: (i, s)),
        compiler_params=pltpu.CompilerParams(
            dimension_semantics=("parallel", "arbitrary"),
            vmem_limit_bytes=vmem_limit,
        ),
        cost_estimate=pl.CostEstimate(
            flops=int(flops),
            transcendentals=int(transcendentals),
            bytes_accessed=int(bytes_accessed),
        ),
    )(slab, a_in, b_big, a_out)


_SINGLE_BUFFER_WEIGHTS_OK = [True]        # resolved once at first call


def local_rfmn_apply(x, packed, cfg):
    """x: (..., D) -> (..., D).  Matches LocalRFMN.forward."""
    D, G, I, P, S = cfg["D"], cfg["G"], cfg["I"], cfg["P"], cfg["S"]
    band, band_p = cfg["band"], cfg["band_p"]
    cdtype = cfg["compute_dtype"]

    lead = x.shape[:-1]
    M = int(math.prod(lead)) if lead else 1
    x2 = jnp.asarray(x).reshape(M, D)
    Mpad = _round_up(max(M, 1), 8)

    # Non-overlapping per-super-group slab with the circular halo, built in a
    # single fused gather + cast pass (this IS the halo materialisation the
    # banded packing needs; duplication over x is only (P+2I)/P).
    j = jnp.arange(band_p)
    feat = ((jnp.arange(S)[:, None] * P - I) * G + j[None, :]) % D     # (S, band_p)
    slab = jnp.where((j < band)[None, None, :], x2[:, feat], 0.0)      # (M, S, band_p)
    slab = slab.reshape(M, S * band_p).astype(cdtype)
    if Mpad != M:                              # <= 7 padded rows (sublane alignment)
        slab = jnp.pad(slab, ((0, Mpad - M), (0, 0)))

    kwargs = dict(cfg=cfg, out_dtype=x.dtype)
    a_in, b_big, a_out = packed["a_in"], packed["b_big"], packed["a_out"]
    if _SINGLE_BUFFER_WEIGHTS_OK[0]:
        try:
            out = _pallas_apply(slab, a_in, b_big, a_out,
                                single_buffer_weights=True, **kwargs)
        except Exception:
            _SINGLE_BUFFER_WEIGHTS_OK[0] = False
            out = _pallas_apply(slab, a_in, b_big, a_out,
                                single_buffer_weights=False, **kwargs)
    else:
        out = _pallas_apply(slab, a_in, b_big, a_out,
                            single_buffer_weights=False, **kwargs)

    return out[:M].reshape(*lead, D)


def local_rfmn_forward(x, params, *, D, D_r, G, I,
                       compute_dtype=jnp.bfloat16, P=None):
    """One-shot convenience (packs + applies).  For repeated use, call
    pack_local_rfmn_params once and reuse the packed weights."""
    packed, cfg = pack_local_rfmn_params(params, D=D, D_r=D_r, G=G, I=I,
                                         compute_dtype=compute_dtype, P=P)
    return local_rfmn_apply(x, packed, cfg)


# ----------------------------------------------------------------------------
# Pure-JAX reference mirroring the torch forward exactly.
# ----------------------------------------------------------------------------
def _reference(x, params, *, D, D_r, G, I):
    Ng = D // G
    base = jnp.arange(-I * G, (I + 1) * G) % D
    idx = (base[None, :] + G * jnp.arange(Ng)[:, None]) % D            # (Ng, L)
    xg = x[..., idx]                                                   # (..., Ng, L)
    h = jnp.tanh(jnp.einsum("...nl,rl->...nr", xg, params["w_in"]) + params["b_in"])
    y = jnp.einsum("...nr,gr->...ng", h, params["w_out"])              # (..., Ng, G)
    return y.reshape(*x.shape[:-1], D)


if __name__ == "__main__":
    # Module hyperparameters (B only sizes a ModuleList with a single layer).
    D, D_r, B, G, I = 16, 32, 1, 4, 1
    L = (2 * I + 1) * G
    batch = 2

    key = jax.random.PRNGKey(0)
    k_x, k_win, k_bin, k_wout = jax.random.split(key, 4)

    # torch nn.Linear layouts: weight is (out_features, in_features).
    params = {
        "w_in": jax.random.normal(k_win, (D_r, L), jnp.float32) * 0.1,
        "b_in": jax.random.normal(k_bin, (D_r,), jnp.float32) * 0.1,
        "w_out": jax.random.normal(k_wout, (G, D_r), jnp.float32) * 0.1,
    }
    x = jax.random.normal(k_x, (batch, D), jnp.float32)

    y_ref = _reference(x, params, D=D, D_r=D_r, G=G, I=I)

    # Exact check with the f32 compute path.
    packed32, cfg32 = pack_local_rfmn_params(params, D=D, D_r=D_r, G=G, I=I,
                                             compute_dtype=jnp.float32)
    y_f32 = local_rfmn_apply(x, packed32, cfg32)
    jax.block_until_ready(y_f32)
    assert y_f32.shape == (batch, D)
    assert jnp.allclose(y_f32, y_ref, atol=1e-5, rtol=1e-5)

    # Performance path: bf16 MXU inputs, f32 accumulation (loosened tolerance).
    packed16, cfg16 = pack_local_rfmn_params(params, D=D, D_r=D_r, G=G, I=I,
                                             compute_dtype=jnp.bfloat16)
    y_bf16 = local_rfmn_apply(x, packed16, cfg16)
    jax.block_until_ready(y_bf16)
    assert y_bf16.shape == (batch, D)
    assert jnp.allclose(y_bf16, y_ref, atol=2e-2, rtol=2e-2)

    print("KERNEL_OK")
</pallas_src>

<mosaic_0001>
module attributes {stable_mosaic.version = 11 : i64} {
  func.func @_rfmn_kernel(%arg0: i32, %arg1: i32, %arg2: memref<8x24xf32, #tpu.memory_space<vmem>>, %arg3: memref<24x128xf32, #tpu.memory_space<vmem>>, %arg4: memref<1x128xf32, #tpu.memory_space<vmem>>, %arg5: memref<128x16xf32, #tpu.memory_space<vmem>>, %arg6: memref<8x16xf32, #tpu.memory_space<vmem>>) attributes {dimension_semantics = [#tpu.dimension_semantics<parallel>, #tpu.dimension_semantics<arbitrary>], iteration_bounds = array<i64: 1, 1>, scalar_prefetch = 0 : i64, scratch_operands = 0 : i64, tpu.core_type = #tpu.core_type<tc>, window_params = [{transform_indices = @transform_0, window_bounds = array<i64: 8, 24>}, {pipeline_mode = #tpu.pipeline_mode<synchronous>, transform_indices = @transform_1, window_bounds = array<i64: 24, 128>}, {pipeline_mode = #tpu.pipeline_mode<synchronous>, transform_indices = @transform_2, window_bounds = array<i64: 1, 128>}, {pipeline_mode = #tpu.pipeline_mode<synchronous>, transform_indices = @transform_3, window_bounds = array<i64: 128, 16>}, {transform_indices = @transform_4, window_bounds = array<i64: 8, 16>}]} {
    %c0 = arith.constant 0 : index
    %c0_0 = arith.constant 0 : index
    %0 = vector.load %arg2[%c0, %c0_0] : memref<8x24xf32, #tpu.memory_space<vmem>>, vector<8x24xf32>
    %c0_1 = arith.constant 0 : index
    %c0_2 = arith.constant 0 : index
    %1 = vector.load %arg3[%c0_1, %c0_2] : memref<24x128xf32, #tpu.memory_space<vmem>>, vector<24x128xf32>
    %cst = arith.constant dense<0.000000e+00> : vector<8x128xf32>
    %2 = tpu.matmul %0, %1, %cst {dimension_numbers = #tpu.dot_dimension_numbers<[1], [0], [0], [1], [0, 0, 1, 1], [], []>} : vector<8x24xf32>, vector<24x128xf32>, vector<8x128xf32> -> vector<8x128xf32>
    %c0_3 = arith.constant 0 : index
    %c0_4 = arith.constant 0 : index
    %3 = vector.load %arg4[%c0_3, %c0_4] : memref<1x128xf32, #tpu.memory_space<vmem>>, vector<1x128xf32>
    %4 = vector.broadcast %3 : vector<1x128xf32> to vector<8x128xf32>
    %5 = arith.addf %2, %4 : vector<8x128xf32>
    %6 = math.tanh %5 : vector<8x128xf32>
    %c0_5 = arith.constant 0 : index
    %c0_6 = arith.constant 0 : index
    %7 = vector.load %arg5[%c0_5, %c0_6] : memref<128x16xf32, #tpu.memory_space<vmem>>, vector<128x16xf32>
    %cst_7 = arith.constant dense<0.000000e+00> : vector<8x16xf32>
    %8 = tpu.matmul %6, %7, %cst_7 {dimension_numbers = #tpu.dot_dimension_numbers<[1], [0], [0], [1], [0, 0, 1, 1], [], []>} : vector<8x128xf32>, vector<128x16xf32>, vector<8x16xf32> -> vector<8x16xf32>
    %c0_8 = arith.constant 0 : index
    %c0_9 = arith.constant 0 : index
    %9 = vector.load %arg6[%c0_8, %c0_9] : memref<8x16xf32, #tpu.memory_space<vmem>>, vector<8x16xf32>
    tpu.vector_store %arg6[%c0_8, %c0_9], %8 {strides = array<i32>} : memref<8x16xf32, #tpu.memory_space<vmem>>, vector<8x16xf32>,
    return
  }
  func.func @transform_0(%arg0: i32, %arg1: i32) -> (i32, i32) {
    %c0_i32 = arith.constant 0 : i32
    return %arg0, %arg1 : i32, i32
  }
  func.func @transform_1(%arg0: i32, %arg1: i32) -> (i32, i32) {
    %c0_i32 = arith.constant 0 : i32
    %c0_i32_0 = arith.constant 0 : i32
    %c0_i32_1 = arith.constant 0 : i32
    return %c0_i32, %c0_i32_0 : i32, i32
  }
  func.func @transform_2(%arg0: i32, %arg1: i32) -> (i32, i32) {
    %c0_i32 = arith.constant 0 : i32
    %c0_i32_0 = arith.constant 0 : i32
    %c0_i32_1 = arith.constant 0 : i32
    return %c0_i32, %c0_i32_0 : i32, i32
  }
  func.func @transform_3(%arg0: i32, %arg1: i32) -> (i32, i32) {
    %c0_i32 = arith.constant 0 : i32
    %c0_i32_0 = arith.constant 0 : i32
    %c0_i32_1 = arith.constant 0 : i32
    return %c0_i32, %c0_i32_0 : i32, i32
  }
  func.func @transform_4(%arg0: i32, %arg1: i32) -> (i32, i32) {
    %c0_i32 = arith.constant 0 : i32
    return %arg0, %arg1 : i32, i32
  }
}

module attributes {stable_mosaic.version = 11 : i64} {
  func.func @_rfmn_kernel(%arg0: i32, %arg1: i32, %arg2: memref<8x24xf32, #tpu.memory_space<vmem>>, %arg3: memref<24x128xf32, #tpu.memory_space<vmem>>, %arg4: memref<1x128xf32, #tpu.memory_space<vmem>>, %arg5: memref<128x16xf32, #tpu.memory_space<vmem>>, %arg6: memref<8x16xf32, #tpu.memory_space<vmem>>) attributes {dimension_semantics = [#tpu.dimension_semantics<parallel>, #tpu.dimension_semantics<arbitrary>], iteration_bounds = array<i64: 1, 1>, scalar_prefetch = 0 : i64, scratch_operands = 0 : i64, tpu.core_type = #tpu.core_type<tc>, window_params = [{transform_indices = @transform_0, window_bounds = array<i64: 8, 24>}, {pipeline_mode = #tpu.pipeline_mode<synchronous>, transform_indices = @transform_1, window_bounds = array<i64: 24, 128>}, {pipeline_mode = #tpu.pipeline_mode<synchronous>, transform_indices = @transform_2, window_bounds = array<i64: 1, 128>}, {pipeline_mode = #tpu.pipeline_mode<synchronous>, transform_indices = @transform_3, window_bounds = array<i64: 128, 16>}, {transform_indices = @transform_4, window_bounds = array<i64: 8, 16>}]} {
    %c0 = arith.constant 0 : index
    %c0_0 = arith.constant 0 : index
    %0 = vector.load %arg2[%c0, %c0_0] : memref<8x24xf32, #tpu.memory_space<vmem>>, vector<8x24xf32>
    %c0_1 = arith.constant 0 : index
    %c0_2 = arith.constant 0 : index
    %1 = vector.load %arg3[%c0_1, %c0_2] : memref<24x128xf32, #tpu.memory_space<vmem>>, vector<24x128xf32>
    %cst = arith.constant dense<0.000000e+00> : vector<8x128xf32>
    %2 = tpu.matmul %0, %1, %cst {dimension_numbers = #tpu.dot_dimension_numbers<[1], [0], [0], [1], [0, 0, 1, 1], [], []>} : vector<8x24xf32>, vector<24x128xf32>, vector<8x128xf32> -> vector<8x128xf32>
    %c0_3 = arith.constant 0 : index
    %c0_4 = arith.constant 0 : index
    %3 = vector.load %arg4[%c0_3, %c0_4] : memref<1x128xf32, #tpu.memory_space<vmem>>, vector<1x128xf32>
    %4 = vector.broadcast %3 : vector<1x128xf32> to vector<8x128xf32>
    %5 = arith.addf %2, %4 : vector<8x128xf32>
    %6 = math.tanh %5 : vector<8x128xf32>
    %c0_5 = arith.constant 0 : index
    %c0_6 = arith.constant 0 : index
    %7 = vector.load %arg5[%c0_5, %c0_6] : memref<128x16xf32, #tpu.memory_space<vmem>>, vector<128x16xf32>
    %cst_7 = arith.constant dense<0.000000e+00> : vector<8x16xf32>
    %8 = tpu.matmul %6, %7, %cst_7 {dimension_numbers = #tpu.dot_dimension_numbers<[1], [0], [0], [1], [0, 0, 1, 1], [], []>} : vector<8x128xf32>, vector<128x16xf32>, vector<8x16xf32> -> vector<8x16xf32>
    %c0_8 = arith.constant 0 : index
    %c0_9 = arith.constant 0 : index
    %9 = vector.load %arg6[%c0_8, %c0_9] : memref<8x16xf32, #tpu.memory_space<vmem>>, vector<8x16xf32>
    tpu.vector_store %arg6[%c0_8, %c0_9], %8 {strides = array<i32>} : memref<8x16xf32, #tpu.memory_space<vmem>>, vector<8x16xf32>,
    return
  }
  func.func @transform_0(%arg0: i32, %arg1: i32) -> (i32, i32) {
    %c0_i32 = arith.constant 0 : i32
    return %arg0, %arg1 : i32, i32
  }
  func.func @transform_1(%arg0: i32, %arg1: i32) -> (i32, i32) {
    %c0_i32 = arith.constant 0 : i32
    %c0_i32_0 = arith.constant 0 : i32
    %c0_i32_1 = arith.constant 0 : i32
    return %c0_i32, %c0_i32_0 : i32, i32
  }
  func.func @transform_2(%arg0: i32, %arg1: i32) -> (i32, i32) {
    %c0_i32 = arith.constant 0 : i32
    %c0_i32_0 = arith.constant 0 : i32
    %c0_i32_1 = arith.constant 0 : i32
    return %c0_i32, %c0_i32_0 : i32, i32
  }
  func.func @transform_3(%arg0: i32, %arg1: i32) -> (i32, i32) {
    %c0_i32 = arith.constant 0 : i32
    %c0_i32_0 = arith.constant 0 : i32
    %c0_i32_1 = arith.constant 0 : i32
    return %c0_i32, %c0_i32_0 : i32, i32
  }
  func.func @transform_4(%arg0: i32, %arg1: i32) -> (i32, i32) {
    %c0_i32 = arith.constant 0 : i32
    return %arg0, %arg1 : i32, i32
  }
}

</mosaic_0001>

<bundles_post_ra>
// kernel: tpu_custom_call.1
= control target key start
LH: loop header
LB: loop body
LE: loop exit
PB: predicated region body
PF: predicated region fallthrough
CT: control target
= control target key end

     0   :  { %vm26_vm0 = vcmask 195584   ;;  %s228_s0 = inlined_call_operand.vmem [shape: f32[8,24], index: 0, kind: input, shape index: {}]   ;;  %s229_s1 = inlined_call_operand.vmem [shape: f32[24,128], index: 1, kind: input, shape index: {}]   ;;  %s230_s2 = inlined_call_operand.vmem [shape: f32[1,128], index: 2, kind: input, shape index: {}]   ;;  %s231_s3 = inlined_call_operand.vmem [shape: f32[128,16], index: 3, kind: input, shape index: {}]   ;;  %s232_s4 = inlined_call_operand.hbm [shape: f32[8,16], index: 4, kind: output, shape index: {}]  }
   0x1   :  { %v21_v0 = vld [vmem:[%s229_s1 + $0x10] sm:$0xff]  ;;  %v20_v1 = vld [vmem:[%s229_s1 + $0x8] sm:$0xff]  ;;  %v66_v2 = vld [vmem:[%s231_s3 + $0x78] sm:$0xff] }
   0x2   :  { %43 = vmatpush.msra.mxu0 %v21_v0  ;;  %v65_v3 = vld [vmem:[%s231_s3 + $0x70] sm:$0xff]  ;;  %v19_v4 = vld [vmem:[%s229_s1] sm:$0xff]  ;;  %67 = vmatpush.msra.mxu1 %v66_v2  ;;  %v64_v6 = vld [vmem:[%s231_s3 + $0x68] sm:$0xff] }
   0x3   :  { %v18_v5 = vld [vmem:[%s228_s0] sm:$0xff] }
   0x4   :  { %44 = vmatpush.msra.mxu0 %v20_v1  ;;  %68 = vmatpush.msra.mxu1 %v65_v3  ;;  %v63_v7 = vld [vmem:[%s231_s3 + $0x60] sm:$0xff] }
   0x6   :  { %45 = vmatpush.msra.mxu0 %v19_v4 }
   0x7   :  { %9 = vsyncpa [#allocation3], 0  ;;  %105 = vmatmul.msk.f32.vlgmr.msra.gmra.mxu0 %vm26_vm0, %v18_v5  ;;  %69 = vmatpush.msra.mxu1 %v64_v6  ;;  %v62_v8 = vld [vmem:[%s231_s3 + $0x58] sm:$0xff]  ;;  %v61_v9 = vld [vmem:[%s231_s3 + $0x50] sm:$0xff]  ;;  %s136_s29 = smov [#allocation2]   ;;  %s96_s0 = sshll.u32 %s232_s4, 4  ;;  %s97_s0 = int_to_ptr.hbm [resolvable:$true] %s96_s0 }
   0x8   :  { %v60_v10 = vld [vmem:[%s231_s3 + $0x48] sm:$0xff]  ;;  %v59_v11 = vld [vmem:[%s231_s3 + $0x40] sm:$0xff]  ;;  %v58_v12 = vld [vmem:[%s231_s3 + $0x38] sm:$0xff]  ;;  %s94_s30 = sshll.u32 %s136_s29, 4  ;;  %vm87_vm1 = vcmask 130048   ;;  %s95_s30 = int_to_ptr.vmem [resolvable:$true] %s94_s30 }
   0x9   :  { %70 = vmatpush.msra.mxu1 %v63_v7  ;;  %v57_v13 = vld [vmem:[%s231_s3 + $0x30] sm:$0xff]  ;;  %v56_v14 = vld [vmem:[%s231_s3 + $0x28] sm:$0xff]  ;;  %v55_v15 = vld [vmem:[%s231_s3 + $0x20] sm:$0xff] }
   0xa   :  { %v54_v16 = vld [vmem:[%s231_s3 + $0x18] sm:$0xff]  ;;  %v53_v17 = vld [vmem:[%s231_s3 + $0x10] sm:$0xff]  ;;  %v52_v18 = vld [vmem:[%s231_s3 + $0x8] sm:$0xff] }
   0xb   :  { %71 = vmatpush.msra.mxu1 %v62_v8  ;;  %v51_v19 = vld [vmem:[%s231_s3] sm:$0xff] }
   0xc   :  { %v107_v20 = vld [vmem:[%s230_s2] ss:$0 sm:$0xff] }
   0xd   :  { %72 = vmatpush.msra.mxu1 %v61_v9 }
   0xf   :  { %73 = vmatpush.msra.mxu1 %v60_v10 }
  0x11   :  { %74 = vmatpush.msra.mxu1 %v59_v11 }
  0x13   :  { %75 = vmatpush.msra.mxu1 %v58_v12 }
  0x15   :  { %76 = vmatpush.msra.mxu1 %v57_v13 }
  0x17   :  { %77 = vmatpush.msra.mxu1 %v56_v14 }
  0x19   :  { %78 = vmatpush.msra.mxu1 %v55_v15 }
  0x1b   :  { %79 = vmatpush.msra.mxu1 %v54_v16 }
  0x1d   :  { %80 = vmatpush.msra.mxu1 %v53_v17 }
  0x1f   :  { %81 = vmatpush.msra.mxu1 %v52_v18 }
  0x21   :  { %82 = vmatpush.msra.mxu1 %v51_v19 }
  0x84   :  { %v47_v21 = vpop.f32.mrf.mxu0 }
  0x85   :  { %v48_v22 = vadd.f32 %v107_v20, %v47_v21 }
  0x87   :  { %108 = vtanh.f32 %v48_v22 }
  0x8d   :  { %v109_v23 = vpop.eup %108 }
  0x8e   :  { %83 = vmatmul.f32.vlgmr.msra.gmra.mxu1 %v109_v23 }
 0x10b   :  { %v84_v24 = vpop.f32.mrf.mxu1 }
 0x10c   :  { %88 = vst.msk [vmem:[#allocation2] sm:$0xff] %vm87_vm1, %v84_v24 }
 0x10d   :  { %99 = dma.vmem_to_hbm [thread:$0]  %s95_s30, 128, %s97_s0, [#allocation3]  }
 0x10e   :  { %134 = dma.done.wait [#allocation3], 128  }
 0x10f   :  { %135 = vsyncadd [#allocation3], 4294967168 }
 0x110   :  { %104 = vsyncpa [#allocation3], 1 }

// kernel: tpu_custom_call.1
= control target key start
LH: loop header
LB: loop body
LE: loop exit
PB: predicated region body
PF: predicated region fallthrough
CT: control target
= control target key end

     0   :  { %vm26_vm0 = vcmask 195584   ;;  %s228_s0 = inlined_call_operand.vmem [shape: f32[8,24], index: 0, kind: input, shape index: {}]   ;;  %s229_s1 = inlined_call_operand.vmem [shape: f32[24,128], index: 1, kind: input, shape index: {}]   ;;  %s230_s2 = inlined_call_operand.vmem [shape: f32[1,128], index: 2, kind: input, shape index: {}]   ;;  %s231_s3 = inlined_call_operand.vmem [shape: f32[128,16], index: 3, kind: input, shape index: {}]   ;;  %s232_s4 = inlined_call_operand.hbm [shape: f32[8,16], index: 4, kind: output, shape index: {}]  }
   0x1   :  { %v21_v0 = vld [vmem:[%s229_s1 + $0x10] sm:$0xff]  ;;  %v20_v1 = vld [vmem:[%s229_s1 + $0x8] sm:$0xff]  ;;  %v66_v2 = vld [vmem:[%s231_s3 + $0x78] sm:$0xff] }
   0x2   :  { %43 = vmatpush.msra.mxu0 %v21_v0  ;;  %v65_v3 = vld [vmem:[%s231_s3 + $0x70] sm:$0xff]  ;;  %v19_v4 = vld [vmem:[%s229_s1] sm:$0xff]  ;;  %67 = vmatpush.msra.mxu1 %v66_v2  ;;  %v64_v6 = vld [vmem:[%s231_s3 + $0x68] sm:$0xff] }
   0x3   :  { %v18_v5 = vld [vmem:[%s228_s0] sm:$0xff] }
   0x4   :  { %44 = vmatpush.msra.mxu0 %v20_v1  ;;  %68 = vmatpush.msra.mxu1 %v65_v3  ;;  %v63_v7 = vld [vmem:[%s231_s3 + $0x60] sm:$0xff] }
   0x6   :  { %45 = vmatpush.msra.mxu0 %v19_v4 }
   0x7   :  { %9 = vsyncpa [#allocation3], 0  ;;  %105 = vmatmul.msk.f32.vlgmr.msra.gmra.mxu0 %vm26_vm0, %v18_v5  ;;  %69 = vmatpush.msra.mxu1 %v64_v6  ;;  %v62_v8 = vld [vmem:[%s231_s3 + $0x58] sm:$0xff]  ;;  %v61_v9 = vld [vmem:[%s231_s3 + $0x50] sm:$0xff]  ;;  %s136_s29 = smov [#allocation2]   ;;  %s96_s0 = sshll.u32 %s232_s4, 4  ;;  %s97_s0 = int_to_ptr.hbm [resolvable:$true] %s96_s0 }
   0x8   :  { %v60_v10 = vld [vmem:[%s231_s3 + $0x48] sm:$0xff]  ;;  %v59_v11 = vld [vmem:[%s231_s3 + $0x40] sm:$0xff]  ;;  %v58_v12 = vld [vmem:[%s231_s3 + $0x38] sm:$0xff]  ;;  %s94_s30 = sshll.u32 %s136_s29, 4  ;;  %vm87_vm1 = vcmask 130048   ;;  %s95_s30 = int_to_ptr.vmem [resolvable:$true] %s94_s30 }
   0x9   :  { %70 = vmatpush.msra.mxu1 %v63_v7  ;;  %v57_v13 = vld [vmem:[%s231_s3 + $0x30] sm:$0xff]  ;;  %v56_v14 = vld [vmem:[%s231_s3 + $0x28] sm:$0xff]  ;;  %v55_v15 = vld [vmem:[%s231_s3 + $0x20] sm:$0xff] }
   0xa   :  { %v54_v16 = vld [vmem:[%s231_s3 + $0x18] sm:$0xff]  ;;  %v53_v17 = vld [vmem:[%s231_s3 + $0x10] sm:$0xff]  ;;  %v52_v18 = vld [vmem:[%s231_s3 + $0x8] sm:$0xff] }
   0xb   :  { %71 = vmatpush.msra.mxu1 %v62_v8  ;;  %v51_v19 = vld [vmem:[%s231_s3] sm:$0xff] }
   0xc   :  { %v107_v20 = vld [vmem:[%s230_s2] ss:$0 sm:$0xff] }
   0xd   :  { %72 = vmatpush.msra.mxu1 %v61_v9 }
   0xf   :  { %73 = vmatpush.msra.mxu1 %v60_v10 }
  0x11   :  { %74 = vmatpush.msra.mxu1 %v59_v11 }
  0x13   :  { %75 = vmatpush.msra.mxu1 %v58_v12 }
  0x15   :  { %76 = vmatpush.msra.mxu1 %v57_v13 }
  0x17   :  { %77 = vmatpush.msra.mxu1 %v56_v14 }
  0x19   :  { %78 = vmatpush.msra.mxu1 %v55_v15 }
  0x1b   :  { %79 = vmatpush.msra.mxu1 %v54_v16 }
  0x1d   :  { %80 = vmatpush.msra.mxu1 %v53_v17 }
  0x1f   :  { %81 = vmatpush.msra.mxu1 %v52_v18 }
  0x21   :  { %82 = vmatpush.msra.mxu1 %v51_v19 }
  0x84   :  { %v47_v21 = vpop.f32.mrf.mxu0 }
  0x85   :  { %v48_v22 = vadd.f32 %v107_v20, %v47_v21 }
  0x87   :  { %108 = vtanh.f32 %v48_v22 }
  0x8d   :  { %v109_v23 = vpop.eup %108 }
  0x8e   :  { %83 = vmatmul.f32.vlgmr.msra.gmra.mxu1 %v109_v23 }
 0x10b   :  { %v84_v24 = vpop.f32.mrf.mxu1 }
 0x10c   :  { %88 = vst.msk [vmem:[#allocation2] sm:$0xff] %vm87_vm1, %v84_v24 }
 0x10d   :  { %99 = dma.vmem_to_hbm [thread:$0]  %s95_s30, 128, %s97_s0, [#allocation3]  }
 0x10e   :  { %134 = dma.done.wait [#allocation3], 128  }
 0x10f   :  { %135 = vsyncadd [#allocation3], 4294967168 }
 0x110   :  { %104 = vsyncpa [#allocation3], 1 }

</bundles_post_ra>
